<compile_context>
chip_gen: v7x
topology: tpu7x:2x2x1
jax: 0.10.0
libtpu: 0.0.40
codegen_flags: <defaults>
</compile_context>

<pallas_src>
import jax
import jax.numpy as jnp
from jax.experimental import pallas as pl
from jax.experimental.pallas import tpu as pltpu


def _round_up(x: int, m: int) -> int:
    return ((x + m - 1) // m) * m


def _mlp_kernel(x_ref, w1t_ref, b1_ref, w2t_ref, b2_ref, o_ref):
    # x:   [TM, Fp]     w1t: [Fp, Np]   b1: [1, Np]
    # h:   [TM, Np]     w2t: [Np, Op]   b2: [1, Op]
    # o:   [TM, Op]
    x = x_ref[...]
    h = jnp.dot(x, w1t_ref[...], preferred_element_type=jnp.float32) + b1_ref[...]
    y = jnp.dot(h, w2t_ref[...], preferred_element_type=jnp.float32) + b2_ref[...]
    o_ref[...] = y.astype(o_ref.dtype)


def fashion_mnist_model_v0(x_nchw, w1, b1, w2, b2):
    """Forward pass of FashionMNISTmodelV0.

    x_nchw: [B, C, H, W] float32
    w1: [neurons, input_features], b1: [neurons]
    w2: [output_features, neurons], b2: [output_features]
    returns: [B, output_features] float32
    """
    B = x_nchw.shape[0]
    # nn.Flatten(): flatten everything but the batch dim (row-major == torch).
    x = x_nchw.reshape(B, -1).astype(jnp.float32)

    F = x.shape[1]
    N = w1.shape[0]
    O = w2.shape[0]

    # Padded, MXU/lane-friendly sizes.
    Fp = _round_up(F, 256)   # contraction dim aligned to 256-wide MXU (also ok on v5e)
    Np = _round_up(N, 128)   # hidden width lane-dense
    Op = _round_up(O, 128)   # output width lane-dense -> unmasked stores

    # Batch tiling: TM rows per grid step (double-buffered by BlockSpec).
    # Small batches use a single tile rounded to a multiple of 8 sublanes.
    TM = 256 if B >= 256 else _round_up(B, 8)
    Bp = _round_up(B, TM)

    # --- Wrapper-side layout plumbing (done once by XLA, zero padding is exact). ---
    # x: [Bp, Fp], zero-padded rows/cols.
    x_p = jnp.zeros((Bp, Fp), jnp.float32).at[:B, :F].set(x)
    # Pre-transposed, zero-padded weights: w1t [Fp, Np], w2t [Np, Op].
    w1t = jnp.zeros((Fp, Np), jnp.float32).at[:F, :N].set(w1.astype(jnp.float32).T)
    w2t = jnp.zeros((Np, Op), jnp.float32).at[:N, :O].set(w2.astype(jnp.float32).T)
    b1_p = jnp.zeros((1, Np), jnp.float32).at[0, :N].set(b1.astype(jnp.float32))
    b2_p = jnp.zeros((1, Op), jnp.float32).at[0, :O].set(b2.astype(jnp.float32))

    grid = (Bp // TM,)

    out_p = pl.pallas_call(
        _mlp_kernel,
        out_shape=jax.ShapeDtypeStruct((Bp, Op), jnp.float32),
        grid_spec=pltpu.PrefetchScalarGridSpec(
            num_scalar_prefetch=0,
            grid=grid,
            in_specs=[
                # x tiles stream along the batch grid axis.
                pl.BlockSpec((TM, Fp), lambda i: (i, 0)),
                # Weights / biases: constant index_map -> resident in VMEM
                # across all grid steps (fetched once, not per step).
                pl.BlockSpec((Fp, Np), lambda i: (0, 0)),
                pl.BlockSpec((1, Np), lambda i: (0, 0)),
                pl.BlockSpec((Np, Op), lambda i: (0, 0)),
                pl.BlockSpec((1, Op), lambda i: (0, 0)),
            ],
            out_specs=pl.BlockSpec((TM, Op), lambda i: (i, 0)),
        ),
        compiler_params=pltpu.CompilerParams(
            # Batch axis is independent -> megacore sharding on v7x.
            dimension_semantics=("parallel",),
        ),
    )(x_p, w1t, b1_p, w2t, b2_p)

    # Slice back to the logical shape.
    return out_p[:B, :O]


def init_params(key, input_features, output_features, neurons):
    """Deterministic init mirroring nn.Linear defaults (U(-1/sqrt(fan_in), +))."""
    k1, k2, k3, k4 = jax.random.split(key, 4)
    lim1 = 1.0 / (input_features ** 0.5)
    lim2 = 1.0 / (neurons ** 0.5)
    w1 = jax.random.uniform(k1, (neurons, input_features), jnp.float32, -lim1, lim1)
    b1 = jax.random.uniform(k2, (neurons,), jnp.float32, -lim1, lim1)
    w2 = jax.random.uniform(k3, (output_features, neurons), jnp.float32, -lim2, lim2)
    b2 = jax.random.uniform(k4, (output_features,), jnp.float32, -lim2, lim2)
    return w1, b1, w2, b2


if __name__ == "__main__":
    key = jax.random.PRNGKey(0)
    kx, kp = jax.random.split(key)

    # Small FashionMNIST-like shapes: batch=8, 1 channel, 28x28 images.
    B, C, H, W = 8, 1, 28, 28
    input_features = C * H * W      # 784
    neurons = 32
    output_features = 10

    x = jax.random.normal(kx, (B, C, H, W), jnp.float32)
    w1, b1, w2, b2 = init_params(kp, input_features, output_features, neurons)

    out = fashion_mnist_model_v0(x, w1, b1, w2, b2)
    out = jax.block_until_ready(out)

    # Pure-JAX reference check (same math as the PyTorch layer stack).
    x_flat = x.reshape(B, -1)
    ref = (x_flat @ w1.T + b1) @ w2.T + b2
    assert out.shape == (B, output_features)
    assert jnp.allclose(out, ref, atol=1e-4, rtol=1e-4)

    print("KERNEL_OK")
</pallas_src>

<mosaic_0001>
module attributes {stable_mosaic.version = 11 : i64} {
  func.func @_mlp_kernel(%arg0: i32, %arg1: memref<8x1024xf32, #tpu.memory_space<vmem>>, %arg2: memref<1024x128xf32, #tpu.memory_space<vmem>>, %arg3: memref<1x128xf32, #tpu.memory_space<vmem>>, %arg4: memref<128x128xf32, #tpu.memory_space<vmem>>, %arg5: memref<1x128xf32, #tpu.memory_space<vmem>>, %arg6: memref<8x128xf32, #tpu.memory_space<vmem>>) attributes {dimension_semantics = [#tpu.dimension_semantics<parallel>], iteration_bounds = array<i64: 1>, scalar_prefetch = 0 : i64, scratch_operands = 0 : i64, tpu.core_type = #tpu.core_type<tc>, window_params = [{transform_indices = @transform_0, window_bounds = array<i64: 8, 1024>}, {pipeline_mode = #tpu.pipeline_mode<synchronous>, transform_indices = @transform_1, window_bounds = array<i64: 1024, 128>}, {pipeline_mode = #tpu.pipeline_mode<synchronous>, transform_indices = @transform_2, window_bounds = array<i64: 1, 128>}, {pipeline_mode = #tpu.pipeline_mode<synchronous>, transform_indices = @transform_3, window_bounds = array<i64: 128, 128>}, {pipeline_mode = #tpu.pipeline_mode<synchronous>, transform_indices = @transform_4, window_bounds = array<i64: 1, 128>}, {transform_indices = @transform_5, window_bounds = array<i64: 8, 128>}]} {
    %c0 = arith.constant 0 : index
    %c0_0 = arith.constant 0 : index
    %0 = vector.load %arg1[%c0, %c0_0] : memref<8x1024xf32, #tpu.memory_space<vmem>>, vector<8x1024xf32>
    %c0_1 = arith.constant 0 : index
    %c0_2 = arith.constant 0 : index
    %1 = vector.load %arg2[%c0_1, %c0_2] : memref<1024x128xf32, #tpu.memory_space<vmem>>, vector<1024x128xf32>
    %cst = arith.constant dense<0.000000e+00> : vector<8x128xf32>
    %2 = tpu.matmul %0, %1, %cst {dimension_numbers = #tpu.dot_dimension_numbers<[1], [0], [0], [1], [0, 0, 1, 1], [], []>} : vector<8x1024xf32>, vector<1024x128xf32>, vector<8x128xf32> -> vector<8x128xf32>
    %c0_3 = arith.constant 0 : index
    %c0_4 = arith.constant 0 : index
    %3 = vector.load %arg3[%c0_3, %c0_4] : memref<1x128xf32, #tpu.memory_space<vmem>>, vector<1x128xf32>
    %4 = vector.broadcast %3 : vector<1x128xf32> to vector<8x128xf32>
    %5 = arith.addf %2, %4 : vector<8x128xf32>
    %c0_5 = arith.constant 0 : index
    %c0_6 = arith.constant 0 : index
    %6 = vector.load %arg4[%c0_5, %c0_6] : memref<128x128xf32, #tpu.memory_space<vmem>>, vector<128x128xf32>
    %cst_7 = arith.constant dense<0.000000e+00> : vector<8x128xf32>
    %7 = tpu.matmul %5, %6, %cst_7 {dimension_numbers = #tpu.dot_dimension_numbers<[1], [0], [0], [1], [0, 0, 1, 1], [], []>} : vector<8x128xf32>, vector<128x128xf32>, vector<8x128xf32> -> vector<8x128xf32>
    %c0_8 = arith.constant 0 : index
    %c0_9 = arith.constant 0 : index
    %8 = vector.load %arg5[%c0_8, %c0_9] : memref<1x128xf32, #tpu.memory_space<vmem>>, vector<1x128xf32>
    %9 = vector.broadcast %8 : vector<1x128xf32> to vector<8x128xf32>
    %10 = arith.addf %7, %9 : vector<8x128xf32>
    %c0_10 = arith.constant 0 : index
    %c0_11 = arith.constant 0 : index
    %11 = vector.load %arg6[%c0_10, %c0_11] : memref<8x128xf32, #tpu.memory_space<vmem>>, vector<8x128xf32>
    tpu.vector_store %arg6[%c0_10, %c0_11], %10 {strides = array<i32>} : memref<8x128xf32, #tpu.memory_space<vmem>>, vector<8x128xf32>,
    return
  }
  func.func @transform_0(%arg0: i32) -> (i32, i32) {
    %c0_i32 = arith.constant 0 : i32
    %c0_i32_0 = arith.constant 0 : i32
    return %arg0, %c0_i32 : i32, i32
  }
  func.func @transform_1(%arg0: i32) -> (i32, i32) {
    %c0_i32 = arith.constant 0 : i32
    %c0_i32_0 = arith.constant 0 : i32
    %c0_i32_1 = arith.constant 0 : i32
    return %c0_i32, %c0_i32_0 : i32, i32
  }
  func.func @transform_2(%arg0: i32) -> (i32, i32) {
    %c0_i32 = arith.constant 0 : i32
    %c0_i32_0 = arith.constant 0 : i32
    %c0_i32_1 = arith.constant 0 : i32
    return %c0_i32, %c0_i32_0 : i32, i32
  }
  func.func @transform_3(%arg0: i32) -> (i32, i32) {
    %c0_i32 = arith.constant 0 : i32
    %c0_i32_0 = arith.constant 0 : i32
    %c0_i32_1 = arith.constant 0 : i32
    return %c0_i32, %c0_i32_0 : i32, i32
  }
  func.func @transform_4(%arg0: i32) -> (i32, i32) {
    %c0_i32 = arith.constant 0 : i32
    %c0_i32_0 = arith.constant 0 : i32
    %c0_i32_1 = arith.constant 0 : i32
    return %c0_i32, %c0_i32_0 : i32, i32
  }
  func.func @transform_5(%arg0: i32) -> (i32, i32) {
    %c0_i32 = arith.constant 0 : i32
    %c0_i32_0 = arith.constant 0 : i32
    return %arg0, %c0_i32 : i32, i32
  }
}

</mosaic_0001>

<bundles_post_ra>
// kernel: tpu_custom_call.1
= control target key start
LH: loop header
LB: loop body
LE: loop exit
PB: predicated region body
PF: predicated region fallthrough
CT: control target
= control target key end

     0   :  { %10 = vsyncpa [#allocation3], 0  ;;  %s1141_s0 = inlined_call_operand.hbm [shape: f32[8,1024], index: 0, kind: input, shape index: {}]   ;;  %s1142_s1 = inlined_call_operand.hbm [shape: f32[1024,128], index: 1, kind: input, shape index: {}]   ;;  %s1143_s2 = inlined_call_operand.vmem [shape: f32[1,128], index: 2, kind: input, shape index: {}]   ;;  %s1144_s3 = inlined_call_operand.hbm [shape: f32[128,128], index: 3, kind: input, shape index: {}]   ;;  %s1145_s4 = inlined_call_operand.vmem [shape: f32[1,128], index: 4, kind: input, shape index: {}]   ;;  %s1146_s5 = inlined_call_operand.hbm [shape: f32[8,128], index: 5, kind: output, shape index: {}]  }
   0x1   :  { %11 = vsyncpa [#allocation6], 0 }
   0x2   :  { %12 = vsyncpa [#allocation4], 0  ;;  %s1042_s18 = smov [#allocation5]   ;;  %s948_s22 = scalar_lea.hbm %s1142_s1, 16384 }
   0x3   :  { %s28_s19 = sshll.u32 %s1042_s18, 4  ;;  %p949_p0 = scmp.ne.s32.totalorder %s1142_s1, %s948_s22  ;;  %s29_s19 = int_to_ptr.vmem [resolvable:$true] %s28_s19 }
   0x4   :  { %p952_p1 = scmp.lt.u32.totalorder %s948_s22, %s1142_s1 }
   0x6   :  { %p954_p2 = pnand %p952_p1, %p949_p0 }
   0x8   :  { %957 = shalt.err (!%p954_p2)
}
   0x9   :  { %s958_s27 = scalar_lea.vmem %s29_s19, 16384  ;;  %p963_p4 = scmp.lt.s32.totalorder %s29_s19, %s29_s19 }
   0xa   :  { %p959_p3 = scmp.ne.s32.totalorder %s29_s19, %s958_s27  ;;  %p964_p5 = scmp.lt.s32.totalorder %s958_s27, %s958_s27 }
   0xc   :  { %p965_p6 = por %p964_p5, %p963_p4 }
   0xe   :  { %p966_p7 = pnand %p965_p6, %p959_p3 }
  0x10   :  { %969 = shalt.err (!%p966_p7)
}
  0x11   :  { %s1043_s28 = smov 128   ;;  %s1044_s29 = smov 8  }
  0x12   :  { %34 = dma.hbm_to_vmem [thread:$0]  %s1142_s1, 16384, %s29_s19, [#allocation6], %s1043_s28, %s1043_s28, %s1044_s29  }
  0x13   :  { %s1045_s7 = smov [#allocation2]   ;;  %s1046_s9 = smov [#allocation7]  }
  0x14   :  { %s19_s8 = sshll.u32 %s1045_s7, 4  ;;  %s42_s10 = sshll.u32 %s1046_s9, 4  ;;  %s20_s8 = int_to_ptr.vmem [resolvable:$true] %s19_s8  ;;  %s43_s10 = int_to_ptr.vmem [resolvable:$true] %s42_s10 }
  0x15   :  { %s970_s13 = scalar_lea.hbm %s1141_s0, 1024 }
  0x16   :  { %p971_p8 = scmp.ne.s32.totalorder %s1141_s0, %s970_s13  ;;  %p974_p9 = scmp.lt.u32.totalorder %s970_s13, %s1141_s0 }
  0x18   :  { %p976_p10 = pnand %p974_p9, %p971_p8 }
  0x1a   :  { %979 = shalt.err (!%p976_p10)
}
  0x1b   :  { %s980_s1 = scalar_lea.vmem %s20_s8, 1024  ;;  %p985_p12 = scmp.lt.s32.totalorder %s20_s8, %s20_s8 }
  0x1c   :  { %p981_p11 = scmp.ne.s32.totalorder %s20_s8, %s980_s1  ;;  %p986_p13 = scmp.lt.s32.totalorder %s980_s1, %s980_s1 }
  0x1e   :  { %p987_p0 = por %p986_p13, %p985_p12 }
  0x20   :  { %p988_p1 = pnand %p987_p0, %p981_p11 }
  0x22   :  { %991 = shalt.err (!%p988_p1)
}
  0x23   :  { %22 = dma.hbm_to_vmem [thread:$0]  %s1141_s0, 1024, %s20_s8, [#allocation3]  }
  0x24   :  { %s992_s22 = scalar_lea.hbm %s1144_s3, 2048 }
  0x25   :  { %p993_p2 = scmp.ne.s32.totalorder %s1144_s3, %s992_s22  ;;  %p996_p3 = scmp.lt.u32.totalorder %s992_s22, %s1144_s3 }
  0x27   :  { %p998_p4 = pnand %p996_p3, %p993_p2 }
  0x29   :  { %1001 = shalt.err (!%p998_p4)
}
  0x2a   :  { %s1002_s27 = scalar_lea.vmem %s43_s10, 2048  ;;  %p1007_p6 = scmp.lt.s32.totalorder %s43_s10, %s43_s10 }
  0x2b   :  { %p1003_p5 = scmp.ne.s32.totalorder %s43_s10, %s1002_s27  ;;  %p1008_p7 = scmp.lt.s32.totalorder %s1002_s27, %s1002_s27 }
  0x2d   :  { %p1009_p8 = por %p1008_p7, %p1007_p6 }
  0x2f   :  { %p1010_p9 = pnand %p1009_p8, %p1003_p5 }
  0x31   :  { %1013 = shalt.err (!%p1010_p9)
}
  0x32   :  { %48 = dma.hbm_to_vmem [thread:$0]  %s1144_s3, 2048, %s43_s10, [#allocation6], %s1043_s28, %s1043_s28, %s1044_s29  }
  0x33   :  { %1036 = dma.done.wait [#allocation3], 1024  }
  0x34   :  { %1037 = vsyncadd [#allocation3], 4294966272 }
  0x35   :  { %1038 = dma.done.wait [#allocation6], 18432  }
  0x36   :  { %1039 = vsyncadd [#allocation6], 4294948864  ;;  %v84_v0 = vld [vmem:[#allocation5 + $0x80] sm:$0xff]  ;;  %v85_v1 = vld [vmem:[#allocation5 + $0x88] sm:$0xff]  ;;  %vm1048_vm0 = vmmov 0  }
  0x37   :  { %v68_v2 = vld [vmem:[#allocation5] sm:$0xff]  ;;  %v787_v3 = vpack.c.bf16 %v85_v1, %v84_v0  ;;  %v69_v4 = vld [vmem:[#allocation5 + $0x8] sm:$0xff]  ;;  %v86_v11 = vld [vmem:[#allocation5 + $0x90] sm:$0xff] }
  0x38   :  { %v116_v5 = vld [vmem:[#allocation5 + $0x180] sm:$0xff]  ;;  %v117_v6 = vld [vmem:[#allocation5 + $0x188] sm:$0xff]  ;;  %v789_v7 = vpack.c.bf16 %v69_v4, %v68_v2  ;;  %v87_v13 = vld [vmem:[#allocation5 + $0x98] sm:$0xff] }
  0x39   :  { %v819_v8 = vpack.c.bf16 %v117_v6, %v116_v5  ;;  %v100_v9 = vld [vmem:[#allocation5 + $0x100] sm:$0xff]  ;;  %v101_v10 = vld [vmem:[#allocation5 + $0x108] sm:$0xff]  ;;  %788 = vmatprep.subr.bf16.mxu0 %v787_v3  ;;  %v70_v14 = vld [vmem:[#allocation5 + $0x10] sm:$0xff]  ;;  %v791_v16 = vpack.c.bf16 %v87_v13, %v86_v11 }
  0x3a   :  { %v821_v12 = vpack.c.bf16 %v101_v10, %v100_v9  ;;  %v71_v15 = vld [vmem:[#allocation5 + $0x18] sm:$0xff]  ;;  %790 = vmatpush3.bf16.msra.mxu0 %v789_v7  ;;  %v118_v18 = vld [vmem:[#allocation5 + $0x190] sm:$0xff]  ;;  %v88_v23 = vld [vmem:[#allocation5 + $0xa0] sm:$0xff] }
  0x3b   :  { %820 = vmatprep.subr.bf16.mxu1 %v819_v8  ;;  %v793_v17 = vpack.c.bf16 %v71_v15, %v70_v14  ;;  %v119_v19 = vld [vmem:[#allocation5 + $0x198] sm:$0xff]  ;;  %v102_v20 = vld [vmem:[#allocation5 + $0x110] sm:$0xff]  ;;  %v89_v24 = vld [vmem:[#allocation5 + $0xa8] sm:$0xff]  ;;  %792 = vmatprep.subr.bf16.mxu0 %v791_v16 }
  0x3c   :  { %822 = vmatpush3.bf16.msra.mxu1 %v821_v12  ;;  %v823_v21 = vpack.c.bf16 %v119_v19, %v118_v18  ;;  %v103_v22 = vld [vmem:[#allocation5 + $0x118] sm:$0xff]  ;;  %v795_v26 = vpack.c.bf16 %v89_v24, %v88_v23  ;;  %v72_v27 = vld [vmem:[#allocation5 + $0x20] sm:$0xff]  ;;  %v73_v28 = vld [vmem:[#allocation5 + $0x28] sm:$0xff] }
  0x3d   :  { %v825_v25 = vpack.c.bf16 %v103_v22, %v102_v20  ;;  %v120_v29 = vld [vmem:[#allocation5 + $0x1a0] sm:$0xff]  ;;  %v121_v30 = vld [vmem:[#allocation5 + $0x1a8] sm:$0xff]  ;;  %v797_v33 = vpack.c.bf16 %v73_v28, %v72_v27  ;;  %v90_v35 = vld [vmem:[#allocation5 + $0xb0] sm:$0xff] }
  0x3e   :  { %824 = vmatprep.subr.bf16.mxu1 %v823_v21  ;;  %v104_v31 = vld [vmem:[#allocation5 + $0x120] sm:$0xff]  ;;  %v105_v32 = vld [vmem:[#allocation5 + $0x128] sm:$0xff]  ;;  %794 = vmatpush3.bf16.msra.mxu0 %v793_v17  ;;  %v827_v34 = vpack.c.bf16 %v121_v30, %v120_v29  ;;  %v91_v36 = vld [vmem:[#allocation5 + $0xb8] sm:$0xff] }
  0x3f   :  { %v74_v37 = vld [vmem:[#allocation5 + $0x30] sm:$0xff]  ;;  %796 = vmatprep.subr.bf16.mxu0 %v795_v26  ;;  %v829_v38 = vpack.c.bf16 %v105_v32, %v104_v31  ;;  %v799_v39 = vpack.c.bf16 %v91_v36, %v90_v35  ;;  %v75_v40 = vld [vmem:[#allocation5 + $0x38] sm:$0xff]  ;;  %v92_v46 = vld [vmem:[#allocation5 + $0xc0] sm:$0xff] }
  0x40   :  { %826 = vmatpush3.bf16.msra.mxu1 %v825_v25  ;;  %v122_v41 = vld [vmem:[#allocation5 + $0x1b0] sm:$0xff]  ;;  %v123_v42 = vld [vmem:[#allocation5 + $0x1b8] sm:$0xff]  ;;  %v93_v47 = vld [vmem:[#allocation5 + $0xc8] sm:$0xff]  ;;  %v801_v48 = vpack.c.bf16 %v75_v40, %v74_v37 }
  0x41   :  { %828 = vmatprep.subr.bf16.mxu1 %v827_v34  ;;  %v831_v43 = vpack.c.bf16 %v123_v42, %v122_v41  ;;  %v106_v44 = vld [vmem:[#allocation5 + $0x130] sm:$0xff]  ;;  %v107_v45 = vld [vmem:[#allocation5 + $0x138] sm:$0xff]  ;;  %v124_v49 = vld [vmem:[#allocation5 + $0x1c0] sm:$0xff]  ;;  %v803_v52 = vpack.c.bf16 %v93_v47, %v92_v46 }
  0x42   :  { %798 = vmatpush3.bf16.msra.mxu0 %v797_v33  ;;  %v125_v50 = vld [vmem:[#allocation5 + $0x1c8] sm:$0xff]  ;;  %v833_v51 = vpack.c.bf16 %v107_v45, %v106_v44  ;;  %v76_v53 = vld [vmem:[#allocation5 + $0x40] sm:$0xff]  ;;  %v94_v58 = vld [vmem:[#allocation5 + $0xd0] sm:$0xff] }
  0x43   :  { %800 = vmatprep.subr.bf16.mxu0 %v799_v39  ;;  %v77_v54 = vld [vmem:[#allocation5 + $0x48] sm:$0xff]  ;;  %v108_v55 = vld [vmem:[#allocation5 + $0x140] sm:$0xff]  ;;  %v835_v56 = vpack.c.bf16 %v125_v50, %v124_v49  ;;  %v95_v59 = vld [vmem:[#allocation5 + $0xd8] sm:$0xff] }
  0x44   :  { %830 = vmatpush3.bf16.msra.mxu1 %v829_v38  ;;  %v109_v57 = vld [vmem:[#allocation5 + $0x148] sm:$0xff]  ;;  %v126_v60 = vld [vmem:[#allocation5 + $0x1d0] sm:$0xff]  ;;  %v127_v61 = vld [vmem:[#allocation5 + $0x1d8] sm:$0xff]  ;;  %v805_v62 = vpack.c.bf16 %v77_v54, %v76_v53  ;;  %v807_v0 = vpack.c.bf16 %v95_v59, %v94_v58 }
  0x45   :  { %832 = vmatprep.subr.bf16.mxu1 %v831_v43  ;;  %v837_v63 = vpack.c.bf16 %v109_v57, %v108_v55  ;;  %v78_v1 = vld [vmem:[#allocation5 + $0x50] sm:$0xff]  ;;  %v79_v2 = vld [vmem:[#allocation5 + $0x58] sm:$0xff]  ;;  %v839_v4 = vpack.c.bf16 %v127_v61, %v126_v60  ;;  %v96_v6 = vld [vmem:[#allocation5 + $0xe0] sm:$0xff] }
  0x46   :  { %802 = vmatpush3.bf16.msra.mxu0 %v801_v48  ;;  %v110_v3 = vld [vmem:[#allocation5 + $0x150] sm:$0xff]  ;;  %v111_v5 = vld [vmem:[#allocation5 + $0x158] sm:$0xff]  ;;  %v97_v7 = vld [vmem:[#allocation5 + $0xe8] sm:$0xff]  ;;  %v809_v10 = vpack.c.bf16 %v79_v2, %v78_v1 }
  0x47   :  { %804 = vmatprep.subr.bf16.mxu0 %v803_v52  ;;  %v128_v8 = vld [vmem:[#allocation5 + $0x1e0] sm:$0xff]  ;;  %v129_v9 = vld [vmem:[#allocation5 + $0x1e8] sm:$0xff]  ;;  %v841_v13 = vpack.c.bf16 %v111_v5, %v110_v3  ;;  %v811_v14 = vpack.c.bf16 %v97_v7, %v96_v6  ;;  %v98_v19 = vld [vmem:[#allocation5 + $0xf0] sm:$0xff] }
  0x48   :  { %834 = vmatpush3.bf16.msra.mxu1 %v833_v51  ;;  %v80_v11 = vld [vmem:[#allocation5 + $0x60] sm:$0xff]  ;;  %v81_v12 = vld [vmem:[#allocation5 + $0x68] sm:$0xff]  ;;  %v843_v18 = vpack.c.bf16 %v129_v9, %v128_v8  ;;  %v99_v20 = vld [vmem:[#allocation5 + $0xf8] sm:$0xff] }
  0x49   :  { %836 = vmatprep.subr.bf16.mxu1 %v835_v56  ;;  %v112_v15 = vld [vmem:[#allocation5 + $0x160] sm:$0xff]  ;;  %v113_v16 = vld [vmem:[#allocation5 + $0x168] sm:$0xff]  ;;  %v63_v21 = vld [vmem:[#allocation2 + $0x18] sm:$0xff]  ;;  %v813_v24 = vpack.c.bf16 %v81_v12, %v80_v11  ;;  %v815_v26 = vpack.c.bf16 %v99_v20, %v98_v19 }
  0x4a   :  { %806 = vmatpush3.bf16.msra.mxu0 %v805_v62  ;;  %v61_v17 = vld [vmem:[#allocation2 + $0x8] sm:$0xff]  ;;  %v130_v22 = vld [vmem:[#allocation5 + $0x1f0] sm:$0xff]  ;;  %v131_v23 = vld [vmem:[#allocation5 + $0x1f8] sm:$0xff]  ;;  %337 = vmatprep.mubr.f32.mxu1 %v63_v21  ;;  %v845_v25 = vpack.c.bf16 %v113_v16, %v112_v15 }
  0x4b   :  { %808 = vmatprep.subr.bf16.mxu0 %v807_v0  ;;  %267 = vmatprep.mubr.f32.mxu0 %v61_v17  ;;  %v82_v27 = vld [vmem:[#allocation5 + $0x70] sm:$0xff]  ;;  %v83_v28 = vld [vmem:[#allocation5 + $0x78] sm:$0xff]  ;;  %v847_v30 = vpack.c.bf16 %v131_v23, %v130_v22  ;;  %v148_v32 = vld [vmem:[#allocation5 + $0x280] sm:$0xff] }
  0x4c   :  { %838 = vmatpush3.bf16.msra.mxu1 %v837_v63  ;;  %v114_v29 = vld [vmem:[#allocation5 + $0x170] sm:$0xff]  ;;  %v115_v31 = vld [vmem:[#allocation5 + $0x178] sm:$0xff]  ;;  %v149_v33 = vld [vmem:[#allocation5 + $0x288] sm:$0xff]  ;;  %v817_v36 = vpack.c.bf16 %v83_v28, %v82_v27 }
  0x4d   :  { %840 = vmatprep.subr.bf16.mxu1 %v839_v4  ;;  %v180_v34 = vld [vmem:[#allocation5 + $0x380] sm:$0xff]  ;;  %v181_v35 = vld [vmem:[#allocation5 + $0x388] sm:$0xff]  ;;  %v849_v37 = vpack.c.bf16 %v115_v31, %v114_v29  ;;  %v851_v38 = vpack.c.bf16 %v149_v33, %v148_v32  ;;  %v150_v44 = vld [vmem:[#allocation5 + $0x290] sm:$0xff] }
  0x4e   :  { %810 = vmatpush3.bf16.msra.mxu0 %v809_v10  ;;  %v132_v39 = vld [vmem:[#allocation5 + $0x200] sm:$0xff]  ;;  %v133_v40 = vld [vmem:[#allocation5 + $0x208] sm:$0xff]  ;;  %v883_v42 = vpack.c.bf16 %v181_v35, %v180_v34  ;;  %v151_v45 = vld [vmem:[#allocation5 + $0x298] sm:$0xff] }
  0x4f   :  { %812 = vmatprep.subr.bf16.mxu0 %v811_v14  ;;  %v164_v41 = vld [vmem:[#allocation5 + $0x300] sm:$0xff]  ;;  %v165_v43 = vld [vmem:[#allocation5 + $0x308] sm:$0xff]  ;;  %v182_v46 = vld [vmem:[#allocation5 + $0x390] sm:$0xff]  ;;  %v853_v49 = vpack.c.bf16 %v133_v40, %v132_v39  ;;  %v855_v52 = vpack.c.bf16 %v151_v45, %v150_v44 }
  0x50   :  { %842 = vmatpush3.bf16.msra.mxu1 %v841_v13  ;;  %v183_v47 = vld [vmem:[#allocation5 + $0x398] sm:$0xff]  ;;  %v60_v48 = vld [vmem:[#allocation2] sm:$0xff]  ;;  %v62_v50 = vld [vmem:[#allocation2 + $0x10] sm:$0xff]  ;;  %v885_v51 = vpack.c.bf16 %v165_v43, %v164_v41 }
  0x51   :  { %844 = vmatprep.subr.bf16.mxu1 %v843_v18  ;;  %v134_v53 = vld [vmem:[#allocation5 + $0x210] sm:$0xff]  ;;  %v135_v54 = vld [vmem:[#allocation5 + $0x218] sm:$0xff]  ;;  %v887_v56 = vpack.c.bf16 %v183_v47, %v182_v46  ;;  %v152_v58 = vld [vmem:[#allocation5 + $0x2a0] sm:$0xff] }
  0x52   :  { %814 = vmatpush3.bf16.msra.mxu0 %v813_v24  ;;  %v166_v55 = vld [vmem:[#allocation5 + $0x310] sm:$0xff]  ;;  %v167_v57 = vld [vmem:[#allocation5 + $0x318] sm:$0xff]  ;;  %v153_v59 = vld [vmem:[#allocation5 + $0x2a8] sm:$0xff]  ;;  %v857_v62 = vpack.c.bf16 %v135_v54, %v134_v53 }
  0x53   :  { %816 = vmatprep.subr.bf16.mxu0 %v815_v26  ;;  %v184_v60 = vld [vmem:[#allocation5 + $0x3a0] sm:$0xff]  ;;  %v185_v61 = vld [vmem:[#allocation5 + $0x3a8] sm:$0xff]  ;;  %v889_v63 = vpack.c.bf16 %v167_v57, %v166_v55  ;;  %v859_v0 = vpack.c.bf16 %v153_v59, %v152_v58  ;;  %v154_v6 = vld [vmem:[#allocation5 + $0x2b0] sm:$0xff] }
  0x54   :  { %846 = vmatpush3.bf16.msra.mxu1 %v845_v25  ;;  %v136_v1 = vld [vmem:[#allocation5 + $0x220] sm:$0xff]  ;;  %v137_v2 = vld [vmem:[#allocation5 + $0x228] sm:$0xff]  ;;  %v891_v4 = vpack.c.bf16 %v185_v61, %v184_v60  ;;  %v155_v7 = vld [vmem:[#allocation5 + $0x2b8] sm:$0xff] }
  0x55   :  { %848 = vmatprep.subr.bf16.mxu1 %v847_v30  ;;  %v168_v3 = vld [vmem:[#allocation5 + $0x320] sm:$0xff]  ;;  %v169_v5 = vld [vmem:[#allocation5 + $0x328] sm:$0xff]  ;;  %v186_v8 = vld [vmem:[#allocation5 + $0x3b0] sm:$0xff]  ;;  %v861_v10 = vpack.c.bf16 %v137_v2, %v136_v1  ;;  %v863_v12 = vpack.c.bf16 %v155_v7, %v154_v6 }
  0x56   :  { %818 = vmatpush3.bf16.msra.mxu0 %v817_v36  ;;  %v187_v9 = vld [vmem:[#allocation5 + $0x3b8] sm:$0xff]  ;;  %v893_v11 = vpack.c.bf16 %v169_v5, %v168_v3  ;;  %v138_v13 = vld [vmem:[#allocation5 + $0x230] sm:$0xff]  ;;  %v156_v18 = vld [vmem:[#allocation5 + $0x2c0] sm:$0xff] }
  0x57   :  { %852 = vmatprep.subr.bf16.mxu0 %v851_v38  ;;  %v139_v14 = vld [vmem:[#allocation5 + $0x238] sm:$0xff]  ;;  %v170_v15 = vld [vmem:[#allocation5 + $0x330] sm:$0xff]  ;;  %v895_v16 = vpack.c.bf16 %v187_v9, %v186_v8  ;;  %v157_v19 = vld [vmem:[#allocation5 + $0x2c8] sm:$0xff] }
  0x58   :  { %850 = vmatpush3.bf16.msra.mxu1 %v849_v37  ;;  %v171_v17 = vld [vmem:[#allocation5 + $0x338] sm:$0xff]  ;;  %v188_v20 = vld [vmem:[#allocation5 + $0x3c0] sm:$0xff]  ;;  %v189_v21 = vld [vmem:[#allocation5 + $0x3c8] sm:$0xff]  ;;  %v865_v22 = vpack.c.bf16 %v139_v14, %v138_v13  ;;  %v867_v26 = vpack.c.bf16 %v157_v19, %v156_v18 }
  0x59   :  { %884 = vmatprep.subr.bf16.mxu1 %v883_v42  ;;  %268 = vmatmul.mubr.f32.vlgmr.msra.gmra.mrb[0].mxu0 %v60_v48  ;;  %v65_v23 = vld [vmem:[#allocation2 + $0x28] sm:$0xff]  ;;  %v67_v24 = vld [vmem:[#allocation2 + $0x38] sm:$0xff]  ;;  %v897_v25 = vpack.c.bf16 %v171_v17, %v170_v15  ;;  %v140_v27 = vld [vmem:[#allocation5 + $0x240] sm:$0xff]  ;;  %v899_v30 = vpack.c.bf16 %v189_v21, %v188_v20 }
  0x5a   :  { %854 = vmatpush3.bf16.msra.mxu0 %v853_v49  ;;  %v141_v28 = vld [vmem:[#allocation5 + $0x248] sm:$0xff]  ;;  %v172_v29 = vld [vmem:[#allocation5 + $0x340] sm:$0xff]  ;;  %v158_v32 = vld [vmem:[#allocation5 + $0x2d0] sm:$0xff]  ;;  %407 = vmatprep.mubr.f32.mxu0 %v65_v23 }
  0x5b   :  { %338 = vmatmul.mubr.f32.vlgmr.msra.gmra.mrb[0].mxu1 %v62_v50  ;;  %856 = vmatprep.subr.bf16.mxu0 %v855_v52  ;;  %v173_v31 = vld [vmem:[#allocation5 + $0x348] sm:$0xff]  ;;  %v159_v33 = vld [vmem:[#allocation5 + $0x2d8] sm:$0xff]  ;;  %v190_v34 = vld [vmem:[#allocation5 + $0x3d0] sm:$0xff]  ;;  %v869_v36 = vpack.c.bf16 %v141_v28, %v140_v27 }
  0x5c   :  { %886 = vmatpush3.bf16.msra.mxu1 %v885_v51  ;;  %v191_v35 = vld [vmem:[#allocation5 + $0x3d8] sm:$0xff]  ;;  %477 = vmatprep.mubr.f32.mxu1 %v67_v24  ;;  %v901_v37 = vpack.c.bf16 %v173_v31, %v172_v29  ;;  %v871_v38 = vpack.c.bf16 %v159_v33, %v158_v32  ;;  %v142_v39 = vld [vmem:[#allocation5 + $0x250] sm:$0xff]  ;;  %v160_v44 = vld [vmem:[#allocation5 + $0x2e0] sm:$0xff]  ;;  %v1049_v33 = vmov 0.0  }
  0x5d   :  { %888 = vmatprep.subr.bf16.mxu1 %v887_v56  ;;  %v143_v40 = vld [vmem:[#allocation5 + $0x258] sm:$0xff]  ;;  %v174_v41 = vld [vmem:[#allocation5 + $0x350] sm:$0xff]  ;;  %v903_v42 = vpack.c.bf16 %v191_v35, %v190_v34  ;;  %v161_v45 = vld [vmem:[#allocation5 + $0x2e8] sm:$0xff] }
  0x5e   :  { %858 = vmatpush3.bf16.msra.mxu0 %v857_v62  ;;  %v175_v43 = vld [vmem:[#allocation5 + $0x358] sm:$0xff]  ;;  %v192_v46 = vld [vmem:[#allocation5 + $0x3e0] sm:$0xff]  ;;  %v193_v47 = vld [vmem:[#allocation5 + $0x3e8] sm:$0xff]  ;;  %v873_v48 = vpack.c.bf16 %v143_v40, %v142_v39  ;;  %v875_v50 = vpack.c.bf16 %v161_v45, %v160_v44 }
  0x5f   :  { %860 = vmatprep.subr.bf16.mxu0 %v859_v0  ;;  %v905_v49 = vpack.c.bf16 %v175_v43, %v174_v41  ;;  %v144_v51 = vld [vmem:[#allocation5 + $0x260] sm:$0xff]  ;;  %v145_v52 = vld [vmem:[#allocation5 + $0x268] sm:$0xff]  ;;  %v907_v54 = vpack.c.bf16 %v193_v47, %v192_v46  ;;  %v162_v56 = vld [vmem:[#allocation5 + $0x2f0] sm:$0xff] }
  0x60   :  { %890 = vmatpush3.bf16.msra.mxu1 %v889_v63  ;;  %v176_v53 = vld [vmem:[#allocation5 + $0x360] sm:$0xff]  ;;  %v177_v55 = vld [vmem:[#allocation5 + $0x368] sm:$0xff]  ;;  %v163_v57 = vld [vmem:[#allocation5 + $0x2f8] sm:$0xff]  ;;  %v877_v60 = vpack.c.bf16 %v145_v52, %v144_v51 }
  0x61   :  { %892 = vmatprep.subr.bf16.mxu1 %v891_v4  ;;  %v194_v58 = vld [vmem:[#allocation5 + $0x3f0] sm:$0xff]  ;;  %v195_v59 = vld [vmem:[#allocation5 + $0x3f8] sm:$0xff]  ;;  %v909_v61 = vpack.c.bf16 %v177_v55, %v176_v53  ;;  %v879_v62 = vpack.c.bf16 %v163_v57, %v162_v56  ;;  %v64_v6 = vld [vmem:[#allocation2 + $0x20] sm:$0xff] }
  0x62   :  { %862 = vmatpush3.bf16.msra.mxu0 %v861_v10  ;;  %v146_v63 = vld [vmem:[#allocation5 + $0x270] sm:$0xff]  ;;  %v147_v0 = vld [vmem:[#allocation5 + $0x278] sm:$0xff]  ;;  %v911_v1 = vpack.c.bf16 %v195_v59, %v194_v58  ;;  %v483_v8 = vld [vmem:[#allocation7] sm:$0xff] }
  0x63   :  { %864 = vmatprep.subr.bf16.mxu0 %v863_v12  ;;  %v178_v2 = vld [vmem:[#allocation5 + $0x370] sm:$0xff]  ;;  %v179_v3 = vld [vmem:[#allocation5 + $0x378] sm:$0xff]  ;;  %v881_v4 = vpack.c.bf16 %v147_v0, %v146_v63  ;;  %v484_v9 = vld [vmem:[#allocation7 + $0x8] sm:$0xff] }
  0x64   :  { %894 = vmatpush3.bf16.msra.mxu1 %v893_v11  ;;  %v913_v5 = vpack.c.bf16 %v179_v3, %v178_v2  ;;  %v66_v7 = vld [vmem:[#allocation2 + $0x30] sm:$0xff]  ;;  %v1047_v11 = vmov 0.0|0.0   ;;  %v916_v12 = vpack.c.bf16 %v484_v9, %v483_v8  ;;  %v486_v13 = vld [vmem:[#allocation7 + $0x18] sm:$0xff]  ;;  %v487_v15 = vld [vmem:[#allocation7 + $0x20] sm:$0xff] }
  0x65   :  { %896 = vmatprep.subr.bf16.mxu1 %v895_v16  ;;  %v485_v10 = vld [vmem:[#allocation7 + $0x10] sm:$0xff]  ;;  %v488_v16 = vld [vmem:[#allocation7 + $0x28] sm:$0xff]  ;;  %v490_v19 = vld [vmem:[#allocation7 + $0x38] sm:$0xff] }
  0x66   :  { %866 = vmatpush3.bf16.msra.mxu0 %v865_v22  ;;  %v919_v14 = vpack.c.bf16 %v486_v13, %v485_v10  ;;  %v922_v17 = vpack.c.bf16 %v488_v16, %v487_v15  ;;  %v489_v18 = vld [vmem:[#allocation7 + $0x30] sm:$0xff]  ;;  %v491_v21 = vld [vmem:[#allocation7 + $0x40] sm:$0xff]  ;;  %v492_v22 = vld [vmem:[#allocation7 + $0x48] sm:$0xff] }
  0x67   :  { %868 = vmatprep.subr.bf16.mxu0 %v867_v26  ;;  %v925_v20 = vpack.c.bf16 %v490_v19, %v489_v18  ;;  %v928_v23 = vpack.c.bf16 %v492_v22, %v491_v21  ;;  %v493_v24 = vld [vmem:[#allocation7 + $0x50] sm:$0xff]  ;;  %v495_v27 = vld [vmem:[#allocation7 + $0x60] sm:$0xff]  ;;  %v496_v28 = vld [vmem:[#allocation7 + $0x68] sm:$0xff] }
  0x68   :  { %898 = vmatpush3.bf16.msra.mxu1 %v897_v25  ;;  %v494_v25 = vld [vmem:[#allocation7 + $0x58] sm:$0xff]  ;;  %v934_v29 = vpack.c.bf16 %v496_v28, %v495_v27  ;;  %v593_v35 = vld [vmem:[%s1143_s2] ss:$0 sm:$0xff]  ;;  %s1050_s2 = smov [#allocation8]  }
  0x69   :  { %900 = vmatprep.subr.bf16.mxu1 %v899_v30  ;;  %v931_v26 = vpack.c.bf16 %v494_v25, %v493_v24  ;;  %v497_v30 = vld [vmem:[#allocation7 + $0x70] sm:$0xff]  ;;  %v498_v31 = vld [vmem:[#allocation7 + $0x78] sm:$0xff]  ;;  %v594_v51 = vld [vmem:[%s1145_s4] ss:$0 sm:$0xff]  ;;  %s583_s7 = sshll.u32 %s1050_s2, 4  ;;  %s584_s7 = int_to_ptr.vmem [resolvable:$true] %s583_s7 }
  0x6a   :  { %870 = vmatpush3.bf16.msra.mxu0 %v869_v36  ;;  %v937_v32 = vpack.c.bf16 %v498_v31, %v497_v30  ;;  %s1014_s8 = scalar_lea.vmem %s584_s7, 128  ;;  %p1019_p11 = scmp.lt.s32.totalorder %s584_s7, %s584_s7 }
  0x6b   :  { %872 = vmatprep.subr.bf16.mxu0 %v871_v38  ;;  %p1015_p10 = scmp.ne.s32.totalorder %s584_s7, %s1014_s8  ;;  %p1020_p12 = scmp.lt.s32.totalorder %s1014_s8, %s1014_s8 }
  0x6c   :  { %902 = vmatpush3.bf16.msra.mxu1 %v901_v37 }
  0x6d   :  { %904 = vmatprep.subr.bf16.mxu1 %v903_v42  ;;  %p1021_p13 = por %p1020_p12, %p1019_p11 }
  0x6e   :  { %874 = vmatpush3.bf16.msra.mxu0 %v873_v48 }
  0x6f   :  { %876 = vmatprep.subr.bf16.mxu0 %v875_v50  ;;  %p1022_p0 = pnand %p1021_p13, %p1015_p10 }
  0x70   :  { %906 = vmatpush3.bf16.msra.mxu1 %v905_v49 }
  0x71   :  { %908 = vmatprep.subr.bf16.mxu1 %v907_v54 }
  0x72   :  { %878 = vmatpush3.bf16.msra.mxu0 %v877_v60 }
  0x73   :  { %880 = vmatprep.subr.bf16.mxu0 %v879_v62 }
  0x74   :  { %910 = vmatpush3.bf16.msra.mxu1 %v909_v61 }
  0x75   :  { %912 = vmatprep.subr.bf16.mxu1 %v911_v1 }
  0x76   :  { %882 = vmatpush3.bf16.msra.mxu0 %v881_v4 }
  0x77   :  { %915 = vmatprep.subr.bf16.mxu0 %v1047_v11 }
  0x78   :  { %914 = vmatpush3.bf16.msra.mxu1 %v913_v5 }
  0x79   :  { %408 = vmatmul.mubr.f32.vlgmr.msra.gmra.mrb[2].mxu0 %v64_v6 }
  0x7a   :  { %917 = vmatpush3.bf16.msra.mxu0 %v916_v12  ;;  %784 = vmatprep.mubr.msk.f32.mxu0 %vm1048_vm0, %v1049_v33 }
  0x7b   :  { %478 = vmatmul.mubr.f32.vlgmr.msra.gmra.mrb[2].mxu1 %v66_v7  ;;  %918 = vmatprep.subr.bf16.mxu0 %v1047_v11 }
  0x7e   :  { %920 = vmatpush3.bf16.msra.mxu0 %v919_v14 }
  0x7f   :  { %921 = vmatprep.subr.bf16.mxu0 %v1047_v11 }
  0x82   :  { %923 = vmatpush3.bf16.msra.mxu0 %v922_v17 }
  0x83   :  { %924 = vmatprep.subr.bf16.mxu0 %v1047_v11 }
  0x86   :  { %926 = vmatpush3.bf16.msra.mxu0 %v925_v20 }
  0x87   :  { %927 = vmatprep.subr.bf16.mxu0 %v1047_v11 }
  0x8a   :  { %929 = vmatpush3.bf16.msra.mxu0 %v928_v23 }
  0x8b   :  { %930 = vmatprep.subr.bf16.mxu0 %v1047_v11 }
  0x8e   :  { %932 = vmatpush3.bf16.msra.mxu0 %v931_v26 }
  0x8f   :  { %933 = vmatprep.subr.bf16.mxu0 %v1047_v11 }
  0x92   :  { %935 = vmatpush3.bf16.msra.mxu0 %v934_v29 }
  0x93   :  { %936 = vmatprep.subr.bf16.mxu0 %v1047_v11 }
  0x96   :  { %938 = vmatpush3.bf16.msra.mxu0 %v937_v32 }
 0x12c   :  { %v627_v34 = vpop.f32.mrb[0].mxu0 }
 0x12d   :  { %v628_v36 = vpop.f32.mrb[1].mxu0 }
 0x12e   :  { %v662_v37 = vpop.f32.mrb[0].mxu1  ;;  %v629_v38 = vadd.f32 %v628_v36, %v627_v34 }
 0x12f   :  { %v663_v39 = vpop.f32.mrb[1].mxu1 }
 0x130   :  { %v664_v40 = vadd.f32 %v663_v39, %v662_v37  ;;  %v270_v41 = vadd.f32 %v629_v38, %v593_v35 }
 0x132   :  { %v340_v42 = vadd.f32 %v664_v40, %v270_v41 }
 0x14c   :  { %v697_v43 = vpop.f32.mrb[2].mxu0 }
 0x14d   :  { %v698_v44 = vpop.f32.mrb[3].mxu0 }
 0x14e   :  { %v732_v45 = vpop.f32.mrb[2].mxu1  ;;  %v699_v46 = vadd.f32 %v698_v44, %v697_v43 }
 0x14f   :  { %v733_v47 = vpop.f32.mrb[3].mxu1 }
 0x150   :  { %v734_v48 = vadd.f32 %v733_v47, %v732_v45  ;;  %v410_v49 = vadd.f32 %v699_v46, %v340_v42 }
 0x152   :  { %v480_v50 = vadd.f32 %v734_v48, %v410_v49 }
 0x154   :  { %785 = vmatmul.mubr.f32.vlgmr.msra.gmra.mrb[4].mxu0 %v480_v50 }
 0x227   :  { %v572_v52 = vpop.f32.mrb[4].mxu0 }
 0x228   :  { %v573_v53 = vadd.f32 %v594_v51, %v572_v52  ;;  %v786_v54 = vpop.f32.mrb[5].mxu0 }
 0x22a   :  { %576 = vst [vmem:[#allocation8] sm:$0xff] %v573_v53 }
 0x22b   :  { %1025 = shalt.err (!%p1022_p0)
}
 0x22c   :  { %s1026_s11 = scalar_lea.hbm %s1146_s5, 128 }
 0x22d   :  { %p1027_p1 = scmp.ne.s32.totalorder %s1146_s5, %s1026_s11  ;;  %p1030_p2 = scmp.lt.u32.totalorder %s1026_s11, %s1146_s5 }
 0x22f   :  { %p1032_p3 = pnand %p1030_p2, %p1027_p1 }
 0x231   :  { %1035 = shalt.err (!%p1032_p3)
}
 0x232   :  { %586 = dma.vmem_to_hbm [thread:$0]  %s584_s7, 128, %s1146_s5, [#allocation4]  }
 0x233   :  { %1040 = dma.done.wait [#allocation4], 128  }
 0x234   :  { %1041 = vsyncadd [#allocation4], 4294967168 }
 0x235   :  { %590 = vsyncpa [#allocation3], 1 }
 0x236   :  { %591 = vsyncpa [#allocation6], 1 }
 0x237   :  { %592 = vsyncpa [#allocation4], 1 }

</bundles_post_ra>
